<compile_context>
chip_gen: v7x
topology: tpu7x:2x2x1
jax: 0.10.0
libtpu: 0.0.40
codegen_flags: <defaults>
</compile_context>

<pallas_src>
import jax
import jax.numpy as jnp
from jax import lax
from jax.experimental import pallas as pl
from jax.experimental.pallas import tpu as pltpu


def _round_up(x, m):
    return (x + m - 1) // m * m


def _fp_kernel(geo_ref, face_ref, proj_ref, len_ref, ff_ref):
    """Fused face-vertex projection + length + front-facing (cone_vec branch).

    geo_ref : (8, 12)        per-angle precomputed scalars (angles on sublanes)
    face_ref: (9, F_TILE)    rows = [v0x v0y v0z v1x v1y v1z v2x v2y v2z]
    proj_ref: (6, 8, F_TILE) rows = [x0 y0 x1 y1 x2 y2]
    len_ref : (3, 8, F_TILE)
    ff_ref  : (1, 8, F_TILE)
    """
    geo = geo_ref[...]                     # (8, 12)
    s0 = geo[:, 0:1]
    s1 = geo[:, 1:2]
    s2 = geo[:, 2:3]
    n0 = geo[:, 3:4]
    n1 = geo[:, 4:5]
    coeff = geo[:, 5:6]
    det_s0 = geo[:, 6:7]
    det_s1 = geo[:, 7:8]
    det_s2 = geo[:, 8:9]
    pxc0 = geo[:, 9:10]                    # where(|u0|>|u1|, 1/u0, 0)
    pxc1 = geo[:, 10:11]                   # where(|u0|>|u1|, 0, 1/u1)
    inv_w2 = geo[:, 11:12]                 # 1 / w2

    v0x = face_ref[0:1, :]
    v0y = face_ref[1:2, :]
    v0z = face_ref[2:3, :]
    v1x = face_ref[3:4, :]
    v1y = face_ref[4:5, :]
    v1z = face_ref[5:6, :]
    v2x = face_ref[6:7, :]
    v2y = face_ref[7:8, :]
    v2z = face_ref[8:9, :]

    # face normal = cross(v1 - v0, v2 - v0), per face (angle independent)
    ax = v1x - v0x
    ay = v1y - v0y
    az = v1z - v0z
    bx = v2x - v0x
    by = v2y - v0y
    bz = v2z - v0z
    nx = ay * bz - az * by
    ny = az * bx - ax * bz
    nz = ax * by - ay * bx

    def project(vx, vy, vz):
        # ray from source to vertex, (8, F_TILE) via (8,1) x (1,F) broadcast
        rx = vx - s0
        ry = vy - s1
        rz = vz - s2
        sq = rx * rx + ry * ry + rz * rz
        inv_len = lax.rsqrt(sq)            # 1 EUP op instead of sqrt + 3 divides
        length = sq * inv_len
        rnx = rx * inv_len
        rny = ry * inv_len
        rnz = rz * inv_len
        nr = n0 * rnx + n1 * rny
        t = coeff / (nr + 1e-10)           # kept exact to match the torch reference
        px = s0 + t * rnx
        py = s1 + t * rny
        pz = s2 + t * rnz
        pd0 = px - det_s0
        pd1 = py - det_s1
        pd2 = pz - det_s2
        proj_x = pd0 * pxc0 + pd1 * pxc1   # pre-selected reciprocal, no divides/select
        proj_y = pd2 * inv_w2
        return proj_x, proj_y, length, rnx, rny, rnz

    p0x, p0y, l0, r0x, r0y, r0z = project(v0x, v0y, v0z)
    p1x, p1y, l1, _, _, _ = project(v1x, v1y, v1z)
    p2x, p2y, l2, _, _, _ = project(v2x, v2y, v2z)

    # lane-dense per-row stores (no intermediate concat)
    proj_ref[0, :, :] = p0x
    proj_ref[1, :, :] = p0y
    proj_ref[2, :, :] = p1x
    proj_ref[3, :, :] = p1y
    proj_ref[4, :, :] = p2x
    proj_ref[5, :, :] = p2y

    len_ref[0, :, :] = l0
    len_ref[1, :, :] = l1
    len_ref[2, :, :] = l2

    ff_ref[0, :, :] = r0x * nx + r0y * ny + r0z * nz


def fp_forward(verts_vx3, faces_fx3, idx_angles, vecs_all, height, width):
    """JAX/Pallas equivalent of FP.forward (cone_vec) up to
    (proj_bxfx6, len_bxfx3, front_facing_bxfx1)."""
    dtype = verts_vx3.dtype
    vecs = vecs_all[idx_angles].astype(dtype)          # (B, 12)
    B = vecs.shape[0]
    F = faces_fx3.shape[0]

    B_TILE = 8                                         # f32 sublanes per vreg
    B_pad = _round_up(B, B_TILE)
    F_pad = _round_up(F, 128)                          # lane-dense
    F_TILE = min(F_pad, 512)
    F_pad = _round_up(F_pad, F_TILE)

    # pad angle dimension by edge-replication (keeps padded math benign)
    if B_pad > B:
        vecs = jnp.concatenate(
            [vecs, jnp.broadcast_to(vecs[-1:], (B_pad - B, 12))], axis=0
        )

    # --- hoisted per-angle scalar algebra (tiny (B_pad, ...) XLA ops) ---
    s = vecs[:, 0:3]
    d = vecs[:, 3:6]                                   # det_pos for cone_vec
    u = vecs[:, 6:9]
    w = vecs[:, 9:12]

    n0 = vecs[:, 7] * vecs[:, 11]                      # u1 * w2
    n1 = -vecs[:, 6] * vecs[:, 11]                     # -u0 * w2
    ns = n0 * s[:, 0] + n1 * s[:, 1]
    dd = -(n0 * d[:, 0] + n1 * d[:, 1])
    coeff = -(ns + dd)

    det_s = d - 0.5 * float(height) * w - 0.5 * float(width) * u   # (B_pad, 3)

    use_u0 = jnp.abs(u[:, 0]) > jnp.abs(u[:, 1])
    pxc0 = jnp.where(use_u0, 1.0 / u[:, 0], 0.0)
    pxc1 = jnp.where(use_u0, 0.0, 1.0 / u[:, 1])
    inv_w2 = 1.0 / w[:, 2]

    geo = jnp.stack(
        [s[:, 0], s[:, 1], s[:, 2],
         n0, n1, coeff,
         det_s[:, 0], det_s[:, 1], det_s[:, 2],
         pxc0, pxc1, inv_w2],
        axis=1,
    ).astype(dtype)                                    # (B_pad, 12)

    # --- face-vertex coordinates, coordinate-major with faces on lanes ---
    vf0 = verts_vx3[faces_fx3[:, 0], :]                # (F, 3)
    vf1 = verts_vx3[faces_fx3[:, 1], :]
    vf2 = verts_vx3[faces_fx3[:, 2], :]
    face_9xF = jnp.concatenate([vf0, vf1, vf2], axis=1).T       # (9, F)
    face_9xF = jnp.pad(face_9xF, ((0, 0), (0, F_pad - F)))      # lane-dense pad

    grid = (B_pad // B_TILE, F_pad // F_TILE)

    proj_6bf, len_3bf, ff_1bf = pl.pallas_call(
        _fp_kernel,
        grid=grid,
        in_specs=[
            pl.BlockSpec((B_TILE, 12), lambda bi, fi: (bi, 0)),
            pl.BlockSpec((9, F_TILE), lambda bi, fi: (0, fi)),
        ],
        out_specs=[
            pl.BlockSpec((6, B_TILE, F_TILE), lambda bi, fi: (0, bi, fi)),
            pl.BlockSpec((3, B_TILE, F_TILE), lambda bi, fi: (0, bi, fi)),
            pl.BlockSpec((1, B_TILE, F_TILE), lambda bi, fi: (0, bi, fi)),
        ],
        out_shape=[
            jax.ShapeDtypeStruct((6, B_pad, F_pad), dtype),
            jax.ShapeDtypeStruct((3, B_pad, F_pad), dtype),
            jax.ShapeDtypeStruct((1, B_pad, F_pad), dtype),
        ],
        compiler_params=pltpu.CompilerParams(
            dimension_semantics=("parallel", "parallel"),
        ),
    )(geo, face_9xF)

    # single transpose back to torch layout at the very end
    proj_bxfx6 = jnp.transpose(proj_6bf[:, :B, :F], (1, 2, 0))          # (B, F, 6)
    len_bxfx3 = jnp.transpose(len_3bf[:, :B, :F], (1, 2, 0))            # (B, F, 3)
    front_facing_bxfx1 = jnp.transpose(ff_1bf[:, :B, :F], (1, 2, 0))    # (B, F, 1)

    # TODO(synk): Rasterizer().apply (custom CUDA triangle rasterizer producing phat) and
    # the subsequent get_valid_mask(phat, max_sino_val) have no clean Pallas equivalent.
    return proj_bxfx6, len_bxfx3, front_facing_bxfx1


if __name__ == "__main__":
    key = jax.random.PRNGKey(0)
    k_verts, k_faces = jax.random.split(key, 2)

    # Synthetic ASTRA-style 'cone_vec' geometry (deterministic, built in-script).
    n_angles = 8
    det_rows = 16   # DetectorRowCount  (height)
    det_cols = 16   # DetectorColCount  (width)
    det_spacing = 1.0
    thetas = jnp.linspace(0.0, jnp.pi, n_angles, endpoint=False)
    zeros = jnp.zeros_like(thetas)
    src = jnp.stack([3.0 * jnp.cos(thetas), 3.0 * jnp.sin(thetas), zeros], axis=1)
    det = jnp.stack([-2.0 * jnp.cos(thetas), -2.0 * jnp.sin(thetas), zeros], axis=1)
    u = jnp.stack([-jnp.sin(thetas), jnp.cos(thetas), zeros], axis=1) * det_spacing
    w = jnp.tile(jnp.array([[0.0, 0.0, 1.0]]), (n_angles, 1)) * det_spacing
    vecs_all = jnp.concatenate([src, det, u, w], axis=1).astype(jnp.float32)  # (n_angles, 12)

    # Small deterministic mesh.
    V, Fc, B = 32, 24, 4
    verts = (jax.random.uniform(k_verts, (V, 3), jnp.float32) - 0.5)          # in [-0.5, 0.5]^3
    faces = jax.random.randint(k_faces, (Fc, 3), 0, V, dtype=jnp.int32)
    idx_angles = jnp.arange(B, dtype=jnp.int32)
    labels_fx2 = jnp.stack([jnp.arange(Fc, dtype=jnp.int32)] * 2, axis=1)     # rasterizer-only input
    mus_n = jnp.array([1.0], jnp.float32)                                     # rasterizer-only input

    proj_bxfx6, len_bxfx3, ff_bxfx1 = fp_forward(
        verts, faces, idx_angles, vecs_all, det_rows, det_cols
    )
    jax.block_until_ready((proj_bxfx6, len_bxfx3, ff_bxfx1))

    assert proj_bxfx6.shape == (B, Fc, 6) and proj_bxfx6.dtype == jnp.float32
    assert len_bxfx3.shape == (B, Fc, 3) and len_bxfx3.dtype == jnp.float32
    assert ff_bxfx1.shape == (B, Fc, 1) and ff_bxfx1.dtype == jnp.float32
    assert bool(jnp.all(jnp.isfinite(proj_bxfx6)))
    assert bool(jnp.all(jnp.isfinite(len_bxfx3)))
    assert bool(jnp.all(jnp.isfinite(ff_bxfx1)))
    print("KERNEL_OK")
</pallas_src>

<mosaic_0001>
module attributes {stable_mosaic.version = 11 : i64} {
  func.func @_fp_kernel(%arg0: i32, %arg1: i32, %arg2: memref<8x12xf32, #tpu.memory_space<vmem>>, %arg3: memref<9x128xf32, #tpu.memory_space<vmem>>, %arg4: memref<6x8x128xf32, #tpu.memory_space<vmem>>, %arg5: memref<3x8x128xf32, #tpu.memory_space<vmem>>, %arg6: memref<1x8x128xf32, #tpu.memory_space<vmem>>) attributes {dimension_semantics = [#tpu.dimension_semantics<parallel>, #tpu.dimension_semantics<parallel>], iteration_bounds = array<i64: 1, 1>, scalar_prefetch = 0 : i64, scratch_operands = 0 : i64, tpu.core_type = #tpu.core_type<tc>, window_params = [{transform_indices = @transform_0, window_bounds = array<i64: 8, 12>}, {transform_indices = @transform_1, window_bounds = array<i64: 9, 128>}, {transform_indices = @transform_2, window_bounds = array<i64: 6, 8, 128>}, {transform_indices = @transform_3, window_bounds = array<i64: 3, 8, 128>}, {transform_indices = @transform_4, window_bounds = array<i64: 1, 8, 128>}]} {
    %c0 = arith.constant 0 : index
    %c0_0 = arith.constant 0 : index
    %0 = vector.load %arg2[%c0, %c0_0] : memref<8x12xf32, #tpu.memory_space<vmem>>, vector<8x12xf32>
    %1 = vector.extract_strided_slice %0 {offsets = [0, 0], sizes = [8, 1], strides = [1, 1]} : vector<8x12xf32> to vector<8x1xf32>
    %2 = vector.extract_strided_slice %0 {offsets = [0, 1], sizes = [8, 1], strides = [1, 1]} : vector<8x12xf32> to vector<8x1xf32>
    %3 = vector.extract_strided_slice %0 {offsets = [0, 2], sizes = [8, 1], strides = [1, 1]} : vector<8x12xf32> to vector<8x1xf32>
    %4 = vector.extract_strided_slice %0 {offsets = [0, 3], sizes = [8, 1], strides = [1, 1]} : vector<8x12xf32> to vector<8x1xf32>
    %5 = vector.extract_strided_slice %0 {offsets = [0, 4], sizes = [8, 1], strides = [1, 1]} : vector<8x12xf32> to vector<8x1xf32>
    %6 = vector.extract_strided_slice %0 {offsets = [0, 5], sizes = [8, 1], strides = [1, 1]} : vector<8x12xf32> to vector<8x1xf32>
    %7 = vector.extract_strided_slice %0 {offsets = [0, 6], sizes = [8, 1], strides = [1, 1]} : vector<8x12xf32> to vector<8x1xf32>
    %8 = vector.extract_strided_slice %0 {offsets = [0, 7], sizes = [8, 1], strides = [1, 1]} : vector<8x12xf32> to vector<8x1xf32>
    %9 = vector.extract_strided_slice %0 {offsets = [0, 8], sizes = [8, 1], strides = [1, 1]} : vector<8x12xf32> to vector<8x1xf32>
    %10 = vector.extract_strided_slice %0 {offsets = [0, 9], sizes = [8, 1], strides = [1, 1]} : vector<8x12xf32> to vector<8x1xf32>
    %11 = vector.extract_strided_slice %0 {offsets = [0, 10], sizes = [8, 1], strides = [1, 1]} : vector<8x12xf32> to vector<8x1xf32>
    %12 = vector.extract_strided_slice %0 {offsets = [0, 11], sizes = [8, 1], strides = [1, 1]} : vector<8x12xf32> to vector<8x1xf32>
    %c0_1 = arith.constant 0 : index
    %c0_2 = arith.constant 0 : index
    %13 = vector.load %arg3[%c0_1, %c0_2] : memref<9x128xf32, #tpu.memory_space<vmem>>, vector<1x128xf32>
    %c1 = arith.constant 1 : index
    %c0_3 = arith.constant 0 : index
    %14 = vector.load %arg3[%c1, %c0_3] : memref<9x128xf32, #tpu.memory_space<vmem>>, vector<1x128xf32>
    %c2 = arith.constant 2 : index
    %c0_4 = arith.constant 0 : index
    %15 = vector.load %arg3[%c2, %c0_4] : memref<9x128xf32, #tpu.memory_space<vmem>>, vector<1x128xf32>
    %c3 = arith.constant 3 : index
    %c0_5 = arith.constant 0 : index
    %16 = vector.load %arg3[%c3, %c0_5] : memref<9x128xf32, #tpu.memory_space<vmem>>, vector<1x128xf32>
    %c4 = arith.constant 4 : index
    %c0_6 = arith.constant 0 : index
    %17 = vector.load %arg3[%c4, %c0_6] : memref<9x128xf32, #tpu.memory_space<vmem>>, vector<1x128xf32>
    %c5 = arith.constant 5 : index
    %c0_7 = arith.constant 0 : index
    %18 = vector.load %arg3[%c5, %c0_7] : memref<9x128xf32, #tpu.memory_space<vmem>>, vector<1x128xf32>
    %c6 = arith.constant 6 : index
    %c0_8 = arith.constant 0 : index
    %19 = vector.load %arg3[%c6, %c0_8] : memref<9x128xf32, #tpu.memory_space<vmem>>, vector<1x128xf32>
    %c7 = arith.constant 7 : index
    %c0_9 = arith.constant 0 : index
    %20 = vector.load %arg3[%c7, %c0_9] : memref<9x128xf32, #tpu.memory_space<vmem>>, vector<1x128xf32>
    %c8 = arith.constant 8 : index
    %c0_10 = arith.constant 0 : index
    %21 = vector.load %arg3[%c8, %c0_10] : memref<9x128xf32, #tpu.memory_space<vmem>>, vector<1x128xf32>
    %22 = arith.subf %16, %13 : vector<1x128xf32>
    %23 = arith.subf %17, %14 : vector<1x128xf32>
    %24 = arith.subf %18, %15 : vector<1x128xf32>
    %25 = arith.subf %19, %13 : vector<1x128xf32>
    %26 = arith.subf %20, %14 : vector<1x128xf32>
    %27 = arith.subf %21, %15 : vector<1x128xf32>
    %28 = arith.mulf %23, %27 : vector<1x128xf32>
    %29 = arith.mulf %24, %26 : vector<1x128xf32>
    %30 = arith.subf %28, %29 : vector<1x128xf32>
    %31 = arith.mulf %24, %25 : vector<1x128xf32>
    %32 = arith.mulf %22, %27 : vector<1x128xf32>
    %33 = arith.subf %31, %32 : vector<1x128xf32>
    %34 = arith.mulf %22, %26 : vector<1x128xf32>
    %35 = arith.mulf %23, %25 : vector<1x128xf32>
    %36 = arith.subf %34, %35 : vector<1x128xf32>
    %37 = vector.broadcast %13 : vector<1x128xf32> to vector<8x128xf32>
    %38 = vector.broadcast %1 : vector<8x1xf32> to vector<8x128xf32>
    %39 = arith.subf %37, %38 : vector<8x128xf32>
    %40 = vector.broadcast %14 : vector<1x128xf32> to vector<8x128xf32>
    %41 = vector.broadcast %2 : vector<8x1xf32> to vector<8x128xf32>
    %42 = arith.subf %40, %41 : vector<8x128xf32>
    %43 = vector.broadcast %15 : vector<1x128xf32> to vector<8x128xf32>
    %44 = vector.broadcast %3 : vector<8x1xf32> to vector<8x128xf32>
    %45 = arith.subf %43, %44 : vector<8x128xf32>
    %46 = arith.mulf %39, %39 : vector<8x128xf32>
    %47 = arith.mulf %42, %42 : vector<8x128xf32>
    %48 = arith.addf %46, %47 : vector<8x128xf32>
    %49 = arith.mulf %45, %45 : vector<8x128xf32>
    %50 = arith.addf %48, %49 : vector<8x128xf32>
    %51 = math.rsqrt %50 : vector<8x128xf32>
    %52 = arith.mulf %50, %51 : vector<8x128xf32>
    %53 = arith.mulf %39, %51 : vector<8x128xf32>
    %54 = arith.mulf %42, %51 : vector<8x128xf32>
    %55 = arith.mulf %45, %51 : vector<8x128xf32>
    %56 = vector.broadcast %4 : vector<8x1xf32> to vector<8x128xf32>
    %57 = arith.mulf %56, %53 : vector<8x128xf32>
    %58 = vector.broadcast %5 : vector<8x1xf32> to vector<8x128xf32>
    %59 = arith.mulf %58, %54 : vector<8x128xf32>
    %60 = arith.addf %57, %59 : vector<8x128xf32>
    %cst = arith.constant 1.000000e-10 : f32
    %61 = vector.broadcast %cst : f32 to vector<8x128xf32>
    %62 = arith.addf %60, %61 : vector<8x128xf32>
    %63 = vector.broadcast %6 : vector<8x1xf32> to vector<8x128xf32>
    %64 = arith.divf %63, %62 : vector<8x128xf32>
    %65 = arith.mulf %64, %53 : vector<8x128xf32>
    %66 = vector.broadcast %1 : vector<8x1xf32> to vector<8x128xf32>
    %67 = arith.addf %66, %65 : vector<8x128xf32>
    %68 = arith.mulf %64, %54 : vector<8x128xf32>
    %69 = vector.broadcast %2 : vector<8x1xf32> to vector<8x128xf32>
    %70 = arith.addf %69, %68 : vector<8x128xf32>
    %71 = arith.mulf %64, %55 : vector<8x128xf32>
    %72 = vector.broadcast %3 : vector<8x1xf32> to vector<8x128xf32>
    %73 = arith.addf %72, %71 : vector<8x128xf32>
    %74 = vector.broadcast %7 : vector<8x1xf32> to vector<8x128xf32>
    %75 = arith.subf %67, %74 : vector<8x128xf32>
    %76 = vector.broadcast %8 : vector<8x1xf32> to vector<8x128xf32>
    %77 = arith.subf %70, %76 : vector<8x128xf32>
    %78 = vector.broadcast %9 : vector<8x1xf32> to vector<8x128xf32>
    %79 = arith.subf %73, %78 : vector<8x128xf32>
    %80 = vector.broadcast %10 : vector<8x1xf32> to vector<8x128xf32>
    %81 = arith.mulf %75, %80 : vector<8x128xf32>
    %82 = vector.broadcast %11 : vector<8x1xf32> to vector<8x128xf32>
    %83 = arith.mulf %77, %82 : vector<8x128xf32>
    %84 = arith.addf %81, %83 : vector<8x128xf32>
    %85 = vector.broadcast %12 : vector<8x1xf32> to vector<8x128xf32>
    %86 = arith.mulf %79, %85 : vector<8x128xf32>
    %87 = vector.broadcast %16 : vector<1x128xf32> to vector<8x128xf32>
    %88 = vector.broadcast %1 : vector<8x1xf32> to vector<8x128xf32>
    %89 = arith.subf %87, %88 : vector<8x128xf32>
    %90 = vector.broadcast %17 : vector<1x128xf32> to vector<8x128xf32>
    %91 = vector.broadcast %2 : vector<8x1xf32> to vector<8x128xf32>
    %92 = arith.subf %90, %91 : vector<8x128xf32>
    %93 = vector.broadcast %18 : vector<1x128xf32> to vector<8x128xf32>
    %94 = vector.broadcast %3 : vector<8x1xf32> to vector<8x128xf32>
    %95 = arith.subf %93, %94 : vector<8x128xf32>
    %96 = arith.mulf %89, %89 : vector<8x128xf32>
    %97 = arith.mulf %92, %92 : vector<8x128xf32>
    %98 = arith.addf %96, %97 : vector<8x128xf32>
    %99 = arith.mulf %95, %95 : vector<8x128xf32>
    %100 = arith.addf %98, %99 : vector<8x128xf32>
    %101 = math.rsqrt %100 : vector<8x128xf32>
    %102 = arith.mulf %100, %101 : vector<8x128xf32>
    %103 = arith.mulf %89, %101 : vector<8x128xf32>
    %104 = arith.mulf %92, %101 : vector<8x128xf32>
    %105 = arith.mulf %95, %101 : vector<8x128xf32>
    %106 = vector.broadcast %4 : vector<8x1xf32> to vector<8x128xf32>
    %107 = arith.mulf %106, %103 : vector<8x128xf32>
    %108 = vector.broadcast %5 : vector<8x1xf32> to vector<8x128xf32>
    %109 = arith.mulf %108, %104 : vector<8x128xf32>
    %110 = arith.addf %107, %109 : vector<8x128xf32>
    %cst_11 = arith.constant 1.000000e-10 : f32
    %111 = vector.broadcast %cst_11 : f32 to vector<8x128xf32>
    %112 = arith.addf %110, %111 : vector<8x128xf32>
    %113 = vector.broadcast %6 : vector<8x1xf32> to vector<8x128xf32>
    %114 = arith.divf %113, %112 : vector<8x128xf32>
    %115 = arith.mulf %114, %103 : vector<8x128xf32>
    %116 = vector.broadcast %1 : vector<8x1xf32> to vector<8x128xf32>
    %117 = arith.addf %116, %115 : vector<8x128xf32>
    %118 = arith.mulf %114, %104 : vector<8x128xf32>
    %119 = vector.broadcast %2 : vector<8x1xf32> to vector<8x128xf32>
    %120 = arith.addf %119, %118 : vector<8x128xf32>
    %121 = arith.mulf %114, %105 : vector<8x128xf32>
    %122 = vector.broadcast %3 : vector<8x1xf32> to vector<8x128xf32>
    %123 = arith.addf %122, %121 : vector<8x128xf32>
    %124 = vector.broadcast %7 : vector<8x1xf32> to vector<8x128xf32>
    %125 = arith.subf %117, %124 : vector<8x128xf32>
    %126 = vector.broadcast %8 : vector<8x1xf32> to vector<8x128xf32>
    %127 = arith.subf %120, %126 : vector<8x128xf32>
    %128 = vector.broadcast %9 : vector<8x1xf32> to vector<8x128xf32>
    %129 = arith.subf %123, %128 : vector<8x128xf32>
    %130 = vector.broadcast %10 : vector<8x1xf32> to vector<8x128xf32>
    %131 = arith.mulf %125, %130 : vector<8x128xf32>
    %132 = vector.broadcast %11 : vector<8x1xf32> to vector<8x128xf32>
    %133 = arith.mulf %127, %132 : vector<8x128xf32>
    %134 = arith.addf %131, %133 : vector<8x128xf32>
    %135 = vector.broadcast %12 : vector<8x1xf32> to vector<8x128xf32>
    %136 = arith.mulf %129, %135 : vector<8x128xf32>
    %137 = vector.broadcast %19 : vector<1x128xf32> to vector<8x128xf32>
    %138 = vector.broadcast %1 : vector<8x1xf32> to vector<8x128xf32>
    %139 = arith.subf %137, %138 : vector<8x128xf32>
    %140 = vector.broadcast %20 : vector<1x128xf32> to vector<8x128xf32>
    %141 = vector.broadcast %2 : vector<8x1xf32> to vector<8x128xf32>
    %142 = arith.subf %140, %141 : vector<8x128xf32>
    %143 = vector.broadcast %21 : vector<1x128xf32> to vector<8x128xf32>
    %144 = vector.broadcast %3 : vector<8x1xf32> to vector<8x128xf32>
    %145 = arith.subf %143, %144 : vector<8x128xf32>
    %146 = arith.mulf %139, %139 : vector<8x128xf32>
    %147 = arith.mulf %142, %142 : vector<8x128xf32>
    %148 = arith.addf %146, %147 : vector<8x128xf32>
    %149 = arith.mulf %145, %145 : vector<8x128xf32>
    %150 = arith.addf %148, %149 : vector<8x128xf32>
    %151 = math.rsqrt %150 : vector<8x128xf32>
    %152 = arith.mulf %150, %151 : vector<8x128xf32>
    %153 = arith.mulf %139, %151 : vector<8x128xf32>
    %154 = arith.mulf %142, %151 : vector<8x128xf32>
    %155 = arith.mulf %145, %151 : vector<8x128xf32>
    %156 = vector.broadcast %4 : vector<8x1xf32> to vector<8x128xf32>
    %157 = arith.mulf %156, %153 : vector<8x128xf32>
    %158 = vector.broadcast %5 : vector<8x1xf32> to vector<8x128xf32>
    %159 = arith.mulf %158, %154 : vector<8x128xf32>
    %160 = arith.addf %157, %159 : vector<8x128xf32>
    %cst_12 = arith.constant 1.000000e-10 : f32
    %161 = vector.broadcast %cst_12 : f32 to vector<8x128xf32>
    %162 = arith.addf %160, %161 : vector<8x128xf32>
    %163 = vector.broadcast %6 : vector<8x1xf32> to vector<8x128xf32>
    %164 = arith.divf %163, %162 : vector<8x128xf32>
    %165 = arith.mulf %164, %153 : vector<8x128xf32>
    %166 = vector.broadcast %1 : vector<8x1xf32> to vector<8x128xf32>
    %167 = arith.addf %166, %165 : vector<8x128xf32>
    %168 = arith.mulf %164, %154 : vector<8x128xf32>
    %169 = vector.broadcast %2 : vector<8x1xf32> to vector<8x128xf32>
    %170 = arith.addf %169, %168 : vector<8x128xf32>
    %171 = arith.mulf %164, %155 : vector<8x128xf32>
    %172 = vector.broadcast %3 : vector<8x1xf32> to vector<8x128xf32>
    %173 = arith.addf %172, %171 : vector<8x128xf32>
    %174 = vector.broadcast %7 : vector<8x1xf32> to vector<8x128xf32>
    %175 = arith.subf %167, %174 : vector<8x128xf32>
    %176 = vector.broadcast %8 : vector<8x1xf32> to vector<8x128xf32>
    %177 = arith.subf %170, %176 : vector<8x128xf32>
    %178 = vector.broadcast %9 : vector<8x1xf32> to vector<8x128xf32>
    %179 = arith.subf %173, %178 : vector<8x128xf32>
    %180 = vector.broadcast %10 : vector<8x1xf32> to vector<8x128xf32>
    %181 = arith.mulf %175, %180 : vector<8x128xf32>
    %182 = vector.broadcast %11 : vector<8x1xf32> to vector<8x128xf32>
    %183 = arith.mulf %177, %182 : vector<8x128xf32>
    %184 = arith.addf %181, %183 : vector<8x128xf32>
    %185 = vector.broadcast %12 : vector<8x1xf32> to vector<8x128xf32>
    %186 = arith.mulf %179, %185 : vector<8x128xf32>
    %c0_13 = arith.constant 0 : index
    %c0_14 = arith.constant 0 : index
    %c0_15 = arith.constant 0 : index
    %187 = vector.load %arg4[%c0_13, %c0_14, %c0_15] : memref<6x8x128xf32, #tpu.memory_space<vmem>>, vector<1x8x128xf32>
    %188 = vector.shape_cast %187 : vector<1x8x128xf32> to vector<8x128xf32>
    %189 = vector.shape_cast %84 : vector<8x128xf32> to vector<1x8x128xf32>
    tpu.vector_store %arg4[%c0_13, %c0_14, %c0_15], %189 {strides = array<i32>} : memref<6x8x128xf32, #tpu.memory_space<vmem>>, vector<1x8x128xf32>,
    %c1_16 = arith.constant 1 : index
    %c0_17 = arith.constant 0 : index
    %c0_18 = arith.constant 0 : index
    %190 = vector.load %arg4[%c1_16, %c0_17, %c0_18] : memref<6x8x128xf32, #tpu.memory_space<vmem>>, vector<1x8x128xf32>
    %191 = vector.shape_cast %190 : vector<1x8x128xf32> to vector<8x128xf32>
    %192 = vector.shape_cast %86 : vector<8x128xf32> to vector<1x8x128xf32>
    tpu.vector_store %arg4[%c1_16, %c0_17, %c0_18], %192 {strides = array<i32>} : memref<6x8x128xf32, #tpu.memory_space<vmem>>, vector<1x8x128xf32>,
    %c2_19 = arith.constant 2 : index
    %c0_20 = arith.constant 0 : index
    %c0_21 = arith.constant 0 : index
    %193 = vector.load %arg4[%c2_19, %c0_20, %c0_21] : memref<6x8x128xf32, #tpu.memory_space<vmem>>, vector<1x8x128xf32>
    %194 = vector.shape_cast %193 : vector<1x8x128xf32> to vector<8x128xf32>
    %195 = vector.shape_cast %134 : vector<8x128xf32> to vector<1x8x128xf32>
    tpu.vector_store %arg4[%c2_19, %c0_20, %c0_21], %195 {strides = array<i32>} : memref<6x8x128xf32, #tpu.memory_space<vmem>>, vector<1x8x128xf32>,
    %c3_22 = arith.constant 3 : index
    %c0_23 = arith.constant 0 : index
    %c0_24 = arith.constant 0 : index
    %196 = vector.load %arg4[%c3_22, %c0_23, %c0_24] : memref<6x8x128xf32, #tpu.memory_space<vmem>>, vector<1x8x128xf32>
    %197 = vector.shape_cast %196 : vector<1x8x128xf32> to vector<8x128xf32>
    %198 = vector.shape_cast %136 : vector<8x128xf32> to vector<1x8x128xf32>
    tpu.vector_store %arg4[%c3_22, %c0_23, %c0_24], %198 {strides = array<i32>} : memref<6x8x128xf32, #tpu.memory_space<vmem>>, vector<1x8x128xf32>,
    %c4_25 = arith.constant 4 : index
    %c0_26 = arith.constant 0 : index
    %c0_27 = arith.constant 0 : index
    %199 = vector.load %arg4[%c4_25, %c0_26, %c0_27] : memref<6x8x128xf32, #tpu.memory_space<vmem>>, vector<1x8x128xf32>
    %200 = vector.shape_cast %199 : vector<1x8x128xf32> to vector<8x128xf32>
    %201 = vector.shape_cast %184 : vector<8x128xf32> to vector<1x8x128xf32>
    tpu.vector_store %arg4[%c4_25, %c0_26, %c0_27], %201 {strides = array<i32>} : memref<6x8x128xf32, #tpu.memory_space<vmem>>, vector<1x8x128xf32>,
    %c5_28 = arith.constant 5 : index
    %c0_29 = arith.constant 0 : index
    %c0_30 = arith.constant 0 : index
    %202 = vector.load %arg4[%c5_28, %c0_29, %c0_30] : memref<6x8x128xf32, #tpu.memory_space<vmem>>, vector<1x8x128xf32>
    %203 = vector.shape_cast %202 : vector<1x8x128xf32> to vector<8x128xf32>
    %204 = vector.shape_cast %186 : vector<8x128xf32> to vector<1x8x128xf32>
    tpu.vector_store %arg4[%c5_28, %c0_29, %c0_30], %204 {strides = array<i32>} : memref<6x8x128xf32, #tpu.memory_space<vmem>>, vector<1x8x128xf32>,
    %c0_31 = arith.constant 0 : index
    %c0_32 = arith.constant 0 : index
    %c0_33 = arith.constant 0 : index
    %205 = vector.load %arg5[%c0_31, %c0_32, %c0_33] : memref<3x8x128xf32, #tpu.memory_space<vmem>>, vector<1x8x128xf32>
    %206 = vector.shape_cast %205 : vector<1x8x128xf32> to vector<8x128xf32>
    %207 = vector.shape_cast %52 : vector<8x128xf32> to vector<1x8x128xf32>
    tpu.vector_store %arg5[%c0_31, %c0_32, %c0_33], %207 {strides = array<i32>} : memref<3x8x128xf32, #tpu.memory_space<vmem>>, vector<1x8x128xf32>,
    %c1_34 = arith.constant 1 : index
    %c0_35 = arith.constant 0 : index
    %c0_36 = arith.constant 0 : index
    %208 = vector.load %arg5[%c1_34, %c0_35, %c0_36] : memref<3x8x128xf32, #tpu.memory_space<vmem>>, vector<1x8x128xf32>
    %209 = vector.shape_cast %208 : vector<1x8x128xf32> to vector<8x128xf32>
    %210 = vector.shape_cast %102 : vector<8x128xf32> to vector<1x8x128xf32>
    tpu.vector_store %arg5[%c1_34, %c0_35, %c0_36], %210 {strides = array<i32>} : memref<3x8x128xf32, #tpu.memory_space<vmem>>, vector<1x8x128xf32>,
    %c2_37 = arith.constant 2 : index
    %c0_38 = arith.constant 0 : index
    %c0_39 = arith.constant 0 : index
    %211 = vector.load %arg5[%c2_37, %c0_38, %c0_39] : memref<3x8x128xf32, #tpu.memory_space<vmem>>, vector<1x8x128xf32>
    %212 = vector.shape_cast %211 : vector<1x8x128xf32> to vector<8x128xf32>
    %213 = vector.shape_cast %152 : vector<8x128xf32> to vector<1x8x128xf32>
    tpu.vector_store %arg5[%c2_37, %c0_38, %c0_39], %213 {strides = array<i32>} : memref<3x8x128xf32, #tpu.memory_space<vmem>>, vector<1x8x128xf32>,
    %214 = vector.broadcast %30 : vector<1x128xf32> to vector<8x128xf32>
    %215 = arith.mulf %53, %214 : vector<8x128xf32>
    %216 = vector.broadcast %33 : vector<1x128xf32> to vector<8x128xf32>
    %217 = arith.mulf %54, %216 : vector<8x128xf32>
    %218 = arith.addf %215, %217 : vector<8x128xf32>
    %219 = vector.broadcast %36 : vector<1x128xf32> to vector<8x128xf32>
    %220 = arith.mulf %55, %219 : vector<8x128xf32>
    %221 = arith.addf %218, %220 : vector<8x128xf32>
    %c0_40 = arith.constant 0 : index
    %c0_41 = arith.constant 0 : index
    %c0_42 = arith.constant 0 : index
    %222 = vector.load %arg6[%c0_40, %c0_41, %c0_42] : memref<1x8x128xf32, #tpu.memory_space<vmem>>, vector<1x8x128xf32>
    %223 = vector.shape_cast %222 : vector<1x8x128xf32> to vector<8x128xf32>
    %224 = vector.shape_cast %221 : vector<8x128xf32> to vector<1x8x128xf32>
    tpu.vector_store %arg6[%c0_40, %c0_41, %c0_42], %224 {strides = array<i32>} : memref<1x8x128xf32, #tpu.memory_space<vmem>>, vector<1x8x128xf32>,
    return
  }
  func.func @transform_0(%arg0: i32, %arg1: i32) -> (i32, i32) {
    %c0_i32 = arith.constant 0 : i32
    %c0_i32_0 = arith.constant 0 : i32
    return %arg0, %c0_i32 : i32, i32
  }
  func.func @transform_1(%arg0: i32, %arg1: i32) -> (i32, i32) {
    %c0_i32 = arith.constant 0 : i32
    %c0_i32_0 = arith.constant 0 : i32
    return %c0_i32, %arg1 : i32, i32
  }
  func.func @transform_2(%arg0: i32, %arg1: i32) -> (i32, i32, i32) {
    %c0_i32 = arith.constant 0 : i32
    %c0_i32_0 = arith.constant 0 : i32
    return %c0_i32, %arg0, %arg1 : i32, i32, i32
  }
  func.func @transform_3(%arg0: i32, %arg1: i32) -> (i32, i32, i32) {
    %c0_i32 = arith.constant 0 : i32
    %c0_i32_0 = arith.constant 0 : i32
    return %c0_i32, %arg0, %arg1 : i32, i32, i32
  }
  func.func @transform_4(%arg0: i32, %arg1: i32) -> (i32, i32, i32) {
    %c0_i32 = arith.constant 0 : i32
    %c0_i32_0 = arith.constant 0 : i32
    return %c0_i32, %arg0, %arg1 : i32, i32, i32
  }
}

</mosaic_0001>

<bundles_post_ra>
// kernel: tpu_custom_call.1
= control target key start
LH: loop header
LB: loop body
LE: loop exit
PB: predicated region body
PF: predicated region fallthrough
CT: control target
= control target key end

     0   :  { %10 = vsyncpa [#allocation3], 0  ;;  %s710_s0 = inlined_call_operand.hbm [shape: f32[8,12], index: 0, kind: input, shape index: {}]   ;;  %s711_s1 = inlined_call_operand.hbm [shape: f32[9,128], index: 1, kind: input, shape index: {}]   ;;  %s712_s2 = inlined_call_operand.hbm [shape: f32[6,8,128], index: 2, kind: output, shape index: {0}]   ;;  %s713_s3 = inlined_call_operand.hbm [shape: f32[3,8,128], index: 3, kind: output, shape index: {1}]   ;;  %s714_s4 = inlined_call_operand.hbm [shape: f32[1,8,128], index: 4, kind: output, shape index: {2}]  }
   0x1   :  { %11 = vsyncpa [#allocation6], 0 }
   0x2   :  { %12 = vsyncpa [#allocation4], 0 }
   0x3   :  { %13 = vsyncpa [#allocation9], 0  ;;  %s490_s15 = smov [#allocation2]   ;;  %s491_s17 = smov [#allocation5]  }
   0x4   :  { %s20_s16 = sshll.u32 %s490_s15, 4  ;;  %s29_s18 = sshll.u32 %s491_s17, 4  ;;  %s21_s16 = int_to_ptr.vmem [resolvable:$true] %s20_s16  ;;  %s534_s18 = int_to_ptr.vmem [resolvable:$true] %s29_s18 }
   0x5   :  { %s372_s21 = scalar_lea.hbm %s710_s0, 128 }
   0x6   :  { %p373_p0 = scmp.ne.s32.totalorder %s710_s0, %s372_s21  ;;  %p376_p1 = scmp.lt.u32.totalorder %s372_s21, %s710_s0 }
   0x8   :  { %p378_p2 = pnand %p376_p1, %p373_p0 }
   0xa   :  { %381 = shalt.err (!%p378_p2)
}
   0xb   :  { %s382_s26 = scalar_lea.vmem %s21_s16, 128  ;;  %p387_p4 = scmp.lt.s32.totalorder %s21_s16, %s21_s16 }
   0xc   :  { %p383_p3 = scmp.ne.s32.totalorder %s21_s16, %s382_s26  ;;  %p388_p5 = scmp.lt.s32.totalorder %s382_s26, %s382_s26 }
   0xe   :  { %p389_p6 = por %p388_p5, %p387_p4 }
  0x10   :  { %p390_p7 = pnand %p389_p6, %p383_p3 }
  0x12   :  { %393 = shalt.err (!%p390_p7)
}
  0x13   :  { %23 = dma.hbm_to_vmem [thread:$0]  %s710_s0, 128, %s21_s16, [#allocation3]  }
  0x14   :  { %s394_s5 = scalar_lea.hbm %s711_s1, 256 }
  0x15   :  { %p395_p8 = scmp.ne.s32.totalorder %s711_s1, %s394_s5  ;;  %p398_p9 = scmp.lt.u32.totalorder %s394_s5, %s711_s1 }
  0x17   :  { %p400_p10 = pnand %p398_p9, %p395_p8 }
  0x19   :  { %403 = shalt.err (!%p400_p10)
}
  0x1a   :  { %s404_s10 = scalar_lea.vmem %s534_s18, 256  ;;  %p409_p12 = scmp.lt.s32.totalorder %s534_s18, %s534_s18 }
  0x1b   :  { %p405_p11 = scmp.ne.s32.totalorder %s534_s18, %s404_s10  ;;  %p410_p13 = scmp.lt.s32.totalorder %s404_s10, %s404_s10 }
  0x1d   :  { %p411_p0 = por %p410_p13, %p409_p12 }
  0x1f   :  { %p412_p1 = pnand %p411_p0, %p405_p11 }
  0x21   :  { %415 = shalt.err (!%p412_p1)
}
  0x22   :  { %s492_s0 = smov 128   ;;  %s493_s11 = smov 8  }
  0x23   :  { %35 = dma.hbm_to_vmem [thread:$0]  %s711_s1, 256, %s534_s18, [#allocation6], %s492_s0, %s492_s0, %s493_s11  }
  0x24   :  { %482 = dma.done.wait [#allocation3], 128  }
  0x25   :  { %483 = vsyncadd [#allocation3], 4294967168 }
  0x26   :  { %484 = dma.done.wait [#allocation6], 256  }
  0x27   :  { %485 = vsyncadd [#allocation6], 4294967040  ;;  %v494_v0 = vmov 0   ;;  %v495_v1 = vmov 2   ;;  %v42_v2 = vld [vmem:[#allocation2] sm:$0xff]  ;;  %v496_v3 = vmov 1   ;;  %v67_v13 = vlaneseq }
  0x28   :  { %348 = vset.pattern.permute.xlu0 %v494_v0  ;;  %350 = vset.pattern.permute.xlu1 %v495_v1  ;;  %v497_v4 = vmov 3   ;;  %v498_v5 = vmov 4   ;;  %v499_v6 = vmov 5   ;;  %v500_v7 = vmov 6   ;;  %v43_v16 = vld [vmem:[#allocation5] sm:$0x1] }
  0x29   :  { %73 = vperm.xlu0 %348, %v42_v2   ;;  %91 = vperm.xlu1 %350, %v42_v2   ;;  %v501_v8 = vmov 8   ;;  %v502_v9 = vmov 7   ;;  %v503_v10 = vmov 11   ;;  %v504_v11 = vmov 9   ;;  %v46_v17 = vld [vmem:[#allocation5 + $0x3] sm:$0x1] }
  0x2a   :  { %v505_v12 = vmov 10   ;;  %v68_v14 = vshrl.u32 %v67_v13, 7  ;;  %v45_v18 = vld [vmem:[#allocation5 + $0x2] sm:$0x1]  ;;  %v48_v19 = vld [vmem:[#allocation5 + $0x5] sm:$0x1]  ;;  %v52_v1 = vsub.f32 %v46_v17, %v43_v16 }
  0x2b   :  { %v51_v20 = vld [vmem:[#allocation5 + $0x8] sm:$0x1]  ;;  %v49_v21 = vld [vmem:[#allocation5 + $0x6] sm:$0x1]  ;;  %v44_v23 = vld [vmem:[#allocation5 + $0x1] sm:$0x1]  ;;  %v54_v58 = vsub.f32 %v48_v19, %v45_v18 }
  0x2c   :  { %v568_v15 = vsub.s32 0, %v68_v14  ;;  %v47_v24 = vld [vmem:[#allocation5 + $0x4] sm:$0x1]  ;;  %v50_v25 = vld [vmem:[#allocation5 + $0x7] sm:$0x1]  ;;  %v57_v59 = vsub.f32 %v51_v20, %v45_v18  ;;  %s506_s1 = smov [#allocation8]  }
  0x2d   :  { %349 = vset.pattern.permute.xlu0 %v496_v3  ;;  %351 = vset.pattern.permute.xlu1 %v497_v4  ;;  %v53_v60 = vsub.f32 %v47_v24, %v44_v23  ;;  %v56_v0 = vsub.f32 %v50_v25, %v44_v23  ;;  %s299_s14 = sshll.u32 %s506_s1, 4  ;;  %s507_s15 = smov [#allocation10]   ;;  %s300_s14 = int_to_ptr.vmem [resolvable:$true] %s299_s14 }
  0x2e   :  { %82 = vperm.xlu0 %349, %v42_v2   ;;  %106 = vperm.xlu1 %351, %v42_v2   ;;  %v70_v22 = vrot.slane %v43_v16, %v568_v15  ;;  %v89_v26 = vrot.slane %v45_v18, %v568_v15  ;;  %v173_v27 = vrot.slane %v48_v19, %v568_v15  ;;  %s312_s16 = sshll.u32 %s507_s15, 4  ;;  %s416_s17 = scalar_lea.vmem %s300_s14, 384  ;;  %s313_s16 = int_to_ptr.vmem [resolvable:$true] %s312_s16 }
  0x2f   :  { %v217_v28 = vrot.slane %v51_v20, %v568_v15  ;;  %v163_v29 = vrot.slane %v46_v17, %v568_v15  ;;  %v207_v32 = vrot.slane %v49_v21, %v568_v15  ;;  %v80_v34 = vrot.slane %v44_v23, %v568_v15  ;;  %p417_p2 = scmp.ne.s32.totalorder %s300_s14, %s416_s17  ;;  %p421_p3 = scmp.lt.s32.totalorder %s300_s14, %s300_s14 }
  0x30   :  { %v168_v35 = vrot.slane %v47_v24, %v568_v15  ;;  %v212_v36 = vrot.slane %v50_v25, %v568_v15  ;;  %v58_v3 = vmul.f32 %v57_v59, %v53_v60  ;;  %v59_v4 = vmul.f32 %v56_v0, %v54_v58  ;;  %p422_p4 = scmp.lt.s32.totalorder %s416_s17, %s416_s17 }
  0x32   :  { %352 = vset.pattern.permute.xlu1 %v498_v5  ;;  %353 = vset.pattern.permute.xlu0 %v499_v6  ;;  %v62_v6 = vmul.f32 %v57_v59, %v52_v1  ;;  %p423_p5 = por %p422_p4, %p421_p3 }
  0x33   :  { %111 = vperm.xlu1 %352, %v42_v2   ;;  %118 = vperm.xlu0 %353, %v42_v2  }
  0x34   :  { %p424_p6 = pnand %p423_p5, %p417_p2 }
  0x37   :  { %354 = vset.pattern.permute.xlu1 %v500_v7  ;;  %356 = vset.pattern.permute.xlu0 %v501_v8  ;;  %v64_v8 = vmul.f32 %v56_v0, %v52_v1 }
  0x38   :  { %130 = vperm.xlu1 %354, %v42_v2   ;;  %140 = vperm.xlu0 %356, %v42_v2  }
  0x3c   :  { %355 = vset.pattern.permute.xlu1 %v502_v9  ;;  %359 = vset.pattern.permute.xlu0 %v503_v10  ;;  %v60_v10 = vsub.f32 %v58_v3, %v59_v4 }
  0x3d   :  { %135 = vperm.xlu1 %355, %v42_v2   ;;  %156 = vperm.xlu0 %359, %v42_v2  }
  0x3e   :  { %v267_v18 = vrot.slane %v60_v10, %v568_v15 }
  0x41   :  { %357 = vset.pattern.permute.xlu1 %v504_v11 }
  0x42   :  { %145 = vperm.xlu1 %357, %v42_v2  }
  0x46   :  { %358 = vset.pattern.permute.xlu1 %v505_v12 }
  0x47   :  { %150 = vperm.xlu1 %358, %v42_v2   ;;  %v55_v2 = vsub.f32 %v49_v21, %v43_v16 }
  0x49   :  { %v61_v5 = vmul.f32 %v55_v2, %v54_v58  ;;  %v65_v9 = vmul.f32 %v55_v2, %v53_v60 }
  0x4b   :  { %v63_v11 = vsub.f32 %v61_v5, %v62_v6  ;;  %v66_v12 = vsub.f32 %v64_v8, %v65_v9 }
  0x4d   :  { %v272_v21 = vrot.slane %v63_v11, %v568_v15 }
  0xa8   :  { %v575_v30 = vpop.permute.xlu0 %73  ;;  %v577_v31 = vpop.permute.xlu1 %91 }
  0xa9   :  { %v76_v33 = vsub.f32 %v70_v22, %v575_v30  ;;  %v585_v37 = vsub.f32 %v89_v26, %v577_v31  ;;  %v588_v38 = vsub.f32 %v173_v27, %v577_v31  ;;  %v591_v39 = vsub.f32 %v217_v28, %v577_v31 }
  0xaa   :  { %v164_v40 = vsub.f32 %v163_v29, %v575_v30  ;;  %v208_v41 = vsub.f32 %v207_v32, %v575_v30  ;;  %v278_v26 = vrot.slane %v66_v12, %v568_v15 }
  0xab   :  { %v95_v43 = vmul.f32 %v76_v33, %v76_v33  ;;  %v98_v47 = vmul.f32 %v585_v37, %v585_v37  ;;  %v178_v48 = vmul.f32 %v588_v38, %v588_v38  ;;  %v222_v49 = vmul.f32 %v591_v39, %v591_v39 }
  0xac   :  { %v175_v50 = vmul.f32 %v164_v40, %v164_v40  ;;  %v219_v53 = vmul.f32 %v208_v41, %v208_v41 }
  0xad   :  { %v595_v42 = vpop.permute.xlu0 %82  ;;  %v107_v7 = vpop.permute.xlu1 %106 }
  0xae   :  { %v85_v44 = vsub.f32 %v80_v34, %v595_v42  ;;  %v169_v45 = vsub.f32 %v168_v35, %v595_v42  ;;  %v213_v46 = vsub.f32 %v212_v36, %v595_v42 }
  0xb0   :  { %v96_v51 = vmul.f32 %v85_v44, %v85_v44  ;;  %v176_v52 = vmul.f32 %v169_v45, %v169_v45  ;;  %v220_v54 = vmul.f32 %v213_v46, %v213_v46 }
  0xb2   :  { %v97_v55 = vadd.f32 %v96_v51, %v95_v43  ;;  %v177_v56 = vadd.f32 %v176_v52, %v175_v50  ;;  %v221_v57 = vadd.f32 %v220_v54, %v219_v53  ;;  %v112_v14 = vpop.permute.xlu1 %111 }
  0xb4   :  { %v99_v61 = vadd.f32 %v98_v47, %v97_v55  ;;  %v179_v62 = vadd.f32 %v178_v48, %v177_v56  ;;  %v223_v63 = vadd.f32 %v222_v49, %v221_v57 }
  0xb6   :  { %360 = vrsqrt.f32 %v99_v61 }
  0xb7   :  { %362 = vrsqrt.f32 %v179_v62 }
  0xb8   :  { %364 = vrsqrt.f32 %v223_v63 }
  0xc0   :  { %v361_v13 = vpop.eup %360 }
  0xc1   :  { %v607_v19 = vpop.eup %362  ;;  %v609_v16 = vmul.f32 %v361_v13, %v76_v33  ;;  %v611_v17 = vmul.f32 %v361_v13, %v85_v44  ;;  %v101_v20 = vmul.f32 %v361_v13, %v99_v61  ;;  %v635_v35 = vmul.f32 %v361_v13, %v585_v37 }
  0xc2   :  { %v614_v22 = vpop.eup %364  ;;  %v617_v23 = vmul.f32 %v607_v19, %v164_v40  ;;  %v620_v24 = vmul.f32 %v607_v19, %v169_v45  ;;  %v181_v25 = vmul.f32 %v607_v19, %v179_v62 }
  0xc3   :  { %v109_v27 = vmul.f32 %v107_v7, %v609_v16  ;;  %v626_v28 = vmul.f32 %v614_v22, %v208_v41  ;;  %v114_v29 = vmul.f32 %v112_v14, %v611_v17  ;;  %v630_v32 = vmul.f32 %v614_v22, %v213_v46  ;;  %259 = vst [vmem:[#allocation8] sm:$0xff] %v101_v20 }
  0xc4   :  { %v185_v33 = vmul.f32 %v617_v23, %v107_v7  ;;  %v186_v34 = vmul.f32 %v620_v24, %v112_v14  ;;  %v225_v15 = vmul.f32 %v614_v22, %v223_v63  ;;  %261 = vst [vmem:[#allocation8 + $0x8] sm:$0xff] %v181_v25  ;;  %v268_v43 = vmul.f32 %v267_v18, %v609_v16 }
  0xc5   :  { %v229_v36 = vmul.f32 %v626_v28, %v107_v7  ;;  %v115_v40 = vadd.f32 %v114_v29, %v109_v27  ;;  %v230_v41 = vmul.f32 %v630_v32, %v112_v14  ;;  %v273_v45 = vmul.f32 %v272_v21, %v611_v17 }
  0xc6   :  { %v187_v44 = vadd.f32 %v186_v34, %v185_v33  ;;  %263 = vst [vmem:[#allocation8 + $0x10] sm:$0xff] %v225_v15 }
  0xc7   :  { %v116_v46 = vadd.f32 1e-10, %v115_v40  ;;  %v231_v37 = vadd.f32 %v230_v41, %v229_v36 }
  0xc8   :  { %427 = shalt.err (!%p424_p6)
}
  0xc9   :  { %s428_s20 = scalar_lea.hbm %s713_s3, 384 }
  0xca   :  { %p429_p7 = scmp.ne.s32.totalorder %s713_s3, %s428_s20  ;;  %p432_p8 = scmp.lt.u32.totalorder %s428_s20, %s713_s3 }
  0xcc   :  { %p434_p9 = pnand %p432_p8, %p429_p7 }
  0xce   :  { %437 = shalt.err (!%p434_p9)
}
  0xcf   :  { %305 = dma.vmem_to_hbm [thread:$0]  %s300_s14, 384, %s713_s3, [#allocation9], %s492_s0, %s492_s0, %s493_s11   ;;  %v188_v47 = vadd.f32 1e-10, %v187_v44  ;;  %v657_v48 = vpop.permute.xlu1 %130  ;;  %v274_v49 = vadd.f32 %v273_v45, %v268_v43  ;;  %v279_v50 = vmul.f32 %v278_v26, %v635_v35  ;;  %366 = vrcp.f32 %v116_v46 }
  0xd0   :  { %v232_v51 = vadd.f32 1e-10, %v231_v37  ;;  %s438_s27 = scalar_lea.vmem %s313_s16, 128  ;;  %p443_p11 = scmp.lt.s32.totalorder %s313_s16, %s313_s16 }
  0xd1   :  { %368 = vrcp.f32 %v188_v47  ;;  %v280_v52 = vadd.f32 %v279_v50, %v274_v49  ;;  %p439_p10 = scmp.ne.s32.totalorder %s313_s16, %s438_s27  ;;  %p444_p12 = scmp.lt.s32.totalorder %s438_s27, %s438_s27 }
  0xd2   :  { %370 = vrcp.f32 %v232_v51 }
  0xd3   :  { %281 = vst [vmem:[#allocation10] sm:$0xff] %v280_v52  ;;  %p445_p13 = por %p444_p12, %p443_p11 }
  0xd5   :  { %p446_p0 = pnand %p445_p13, %p439_p10 }
  0xd7   :  { %449 = shalt.err (!%p446_p0)
}
  0xd8   :  { %s450_s29 = scalar_lea.hbm %s714_s4, 128 }
  0xd9   :  { %p451_p1 = scmp.ne.s32.totalorder %s714_s4, %s450_s29  ;;  %p454_p2 = scmp.lt.u32.totalorder %s450_s29, %s714_s4 }
  0xdb   :  { %p456_p3 = pnand %p454_p2, %p451_p1 }
  0xdd   :  { %459 = shalt.err (!%p456_p3)
}
  0xde   :  { %315 = dma.vmem_to_hbm [thread:$0]  %s313_s16, 128, %s714_s4, [#allocation9]   ;;  %v136_v53 = vpop.permute.xlu1 %135  ;;  %v119_v54 = vpop.permute.xlu0 %118  ;;  %v184_v62 = vmul.f32 %v607_v19, %v588_v38  ;;  %v228_v63 = vmul.f32 %v614_v22, %v591_v39 }
  0xdf   :  { %v367_v55 = vpop.eup %366  ;;  %s508_s4 = smov [#allocation7]  }
  0xe0   :  { %v369_v56 = vpop.eup %368  ;;  %v122_v57 = vmul.f32 %v367_v55, %v119_v54  ;;  %s287_s10 = sshll.u32 %s508_s4, 4  ;;  %s288_s10 = int_to_ptr.vmem [resolvable:$true] %s287_s10 }
  0xe1   :  { %v371_v60 = vpop.eup %370  ;;  %v190_v61 = vmul.f32 %v369_v56, %v119_v54  ;;  %s460_s12 = scalar_lea.vmem %s288_s10, 768  ;;  %p465_p5 = scmp.lt.s32.totalorder %s288_s10, %s288_s10 }
  0xe2   :  { %v146_v58 = vpop.permute.xlu1 %145  ;;  %v141_v59 = vpop.permute.xlu0 %140  ;;  %v123_v0 = vmul.f32 %v122_v57, %v609_v16  ;;  %v234_v1 = vmul.f32 %v371_v60, %v119_v54  ;;  %v127_v2 = vmul.f32 %v122_v57, %v635_v35  ;;  %v125_v3 = vmul.f32 %v122_v57, %v611_v17  ;;  %p461_p4 = scmp.ne.s32.totalorder %s288_s10, %s460_s12  ;;  %p466_p6 = scmp.lt.s32.totalorder %s460_s12, %s460_s12 }
  0xe3   :  { %v191_v4 = vmul.f32 %v190_v61, %v617_v23  ;;  %v195_v5 = vmul.f32 %v190_v61, %v184_v62  ;;  %v193_v6 = vmul.f32 %v190_v61, %v620_v24 }
  0xe4   :  { %v235_v7 = vmul.f32 %v234_v1, %v626_v28  ;;  %v124_v8 = vadd.f32 %v123_v0, %v575_v30  ;;  %v128_v38 = vadd.f32 %v127_v2, %v577_v31  ;;  %v239_v9 = vmul.f32 %v234_v1, %v228_v63  ;;  %p467_p7 = por %p466_p6, %p465_p5 }
  0xe5   :  { %v192_v39 = vadd.f32 %v191_v4, %v575_v30  ;;  %v196_v10 = vadd.f32 %v195_v5, %v577_v31  ;;  %v126_v11 = vadd.f32 %v125_v3, %v595_v42  ;;  %v194_v12 = vadd.f32 %v193_v6, %v595_v42 }
  0xe6   :  { %v133_v13 = vsub.f32 %v124_v8, %v657_v48  ;;  %v236_v14 = vadd.f32 %v235_v7, %v575_v30  ;;  %v240_v18 = vadd.f32 %v239_v9, %v577_v31  ;;  %v143_v19 = vsub.f32 %v128_v38, %v141_v59  ;;  %v151_v16 = vpop.permute.xlu1 %150  ;;  %v157_v17 = vpop.permute.xlu0 %156  ;;  %p468_p8 = pnand %p467_p7, %p461_p4 }
  0xe7   :  { %v197_v20 = vsub.f32 %v192_v39, %v657_v48  ;;  %v199_v21 = vsub.f32 %v196_v10, %v141_v59  ;;  %v138_v22 = vsub.f32 %v126_v11, %v136_v53  ;;  %v198_v23 = vsub.f32 %v194_v12, %v136_v53 }
  0xe8   :  { %v148_v24 = vmul.f32 %v146_v58, %v133_v13  ;;  %v241_v25 = vsub.f32 %v236_v14, %v657_v48  ;;  %v243_v26 = vsub.f32 %v240_v18, %v141_v59  ;;  %v237_v27 = vmul.f32 %v234_v1, %v630_v32 }
  0xe9   :  { %v200_v28 = vmul.f32 %v197_v20, %v146_v58  ;;  %v153_v29 = vmul.f32 %v151_v16, %v138_v22  ;;  %v201_v33 = vmul.f32 %v198_v23, %v151_v16  ;;  %v159_v30 = vmul.f32 %v157_v17, %v143_v19 }
  0xea   :  { %v238_v31 = vadd.f32 %v237_v27, %v595_v42  ;;  %v203_v34 = vmul.f32 %v199_v21, %v157_v17  ;;  %v247_v35 = vmul.f32 %v243_v26, %v157_v17  ;;  %v244_v40 = vmul.f32 %v241_v25, %v146_v58 }
  0xeb   :  { %v154_v15 = vadd.f32 %v153_v29, %v148_v24  ;;  %v202_v36 = vadd.f32 %v201_v33, %v200_v28  ;;  %250 = vst [vmem:[#allocation7 + $0x8] sm:$0xff] %v159_v30 }
  0xec   :  { %v242_v41 = vsub.f32 %v238_v31, %v136_v53  ;;  %254 = vst [vmem:[#allocation7 + $0x18] sm:$0xff] %v203_v34  ;;  %258 = vst [vmem:[#allocation7 + $0x28] sm:$0xff] %v247_v35 }
  0xed   :  { %248 = vst [vmem:[#allocation7] sm:$0xff] %v154_v15  ;;  %252 = vst [vmem:[#allocation7 + $0x10] sm:$0xff] %v202_v36 }
  0xee   :  { %v245_v32 = vmul.f32 %v242_v41, %v151_v16 }
  0xf0   :  { %v246_v43 = vadd.f32 %v245_v32, %v244_v40 }
  0xf2   :  { %256 = vst [vmem:[#allocation7 + $0x20] sm:$0xff] %v246_v43 }
  0xf3   :  { %471 = shalt.err (!%p468_p8)
}
  0xf4   :  { %s472_s14 = scalar_lea.hbm %s712_s2, 768 }
  0xf5   :  { %p473_p9 = scmp.ne.s32.totalorder %s712_s2, %s472_s14  ;;  %p476_p10 = scmp.lt.u32.totalorder %s472_s14, %s712_s2 }
  0xf7   :  { %p478_p11 = pnand %p476_p10, %p473_p9 }
  0xf9   :  { %481 = shalt.err (!%p478_p11)
}
  0xfa   :  { %293 = dma.vmem_to_hbm [thread:$0]  %s288_s10, 768, %s712_s2, [#allocation4], %s492_s0, %s492_s0, %s493_s11  }
  0xfb   :  { %486 = dma.done.wait [#allocation4], 768  }
  0xfc   :  { %487 = vsyncadd [#allocation4], 4294966528 }
  0xfd   :  { %488 = dma.done.wait [#allocation9], 512  }
  0xfe   :  { %489 = vsyncadd [#allocation9], 4294966784 }
  0xff   :  { %325 = vsyncpa [#allocation3], 1 }
 0x100   :  { %326 = vsyncpa [#allocation6], 1 }
 0x101   :  { %327 = vsyncpa [#allocation4], 1 }
 0x102   :  { %328 = vsyncpa [#allocation9], 1 }

</bundles_post_ra>
